<compile_context>
chip_gen: v6e
topology: v6e:2x2x1
jax: 0.10.0
libtpu: 0.0.40
codegen_flags: <defaults>
</compile_context>

<pallas_src>
import functools

import jax
import jax.numpy as jnp
from jax.experimental import pallas as pl
from jax.experimental.pallas import tpu as pltpu

EPS = 1e-5  # PyTorch GroupNorm default eps


def conv_tr_kernel(x_ref, w_ref, p_ref, a_ref, o_ref, *, c_out, hw, n_per_step):
    # x_ref : (n_per_step, Cin, HW)  f32   channels on sublanes, HW on lanes
    # w_ref : (4*Cout, Cin)          bf16  rows tap-major (t = kh*2+kw), c_out minor
    # p_ref : (2, 4*Cout, 1)         f32   [GN gamma, GN beta], tiled per tap-row
    # a_ref : (1,)                   f32   PReLU slope (SMEM scalar)
    # o_ref : (n_per_step, 4*Cout, HW) bf16
    w = w_ref[...]                      # (4C, Cin) bf16, loaded once per grid step
    gamma_r = p_ref[0]                  # (4C, 1)
    beta_r = p_ref[1]                   # (4C, 1)
    alpha = a_ref[0]
    count = 4.0 * hw

    for n in range(n_per_step):         # static, small; traced straight-line
        # cast to bf16 in VMEM (input DMA'd as f32 -> no wrapper-side cast pass)
        x = x_ref[n].astype(jnp.bfloat16)                         # (Cin, HW)

        # ConvTranspose2d(k=2, s=2) == one MXU matmul; lane axis = HW (dense stores).
        # NOTE: conv bias intentionally omitted — cancelled by GroupNorm mean subtraction.
        y = jnp.dot(w, x, preferred_element_type=jnp.float32)     # (4C, HW) f32

        # --- GroupNorm (groups == channels): per-channel stats over all 4*HW positions ---
        row_sum = jnp.sum(y, axis=1, keepdims=True)               # (4C, 1)
        row_ssq = jnp.sum(y * y, axis=1, keepdims=True)           # (4C, 1)
        ch_sum = (row_sum[0 * c_out:1 * c_out] + row_sum[1 * c_out:2 * c_out]
                  + row_sum[2 * c_out:3 * c_out] + row_sum[3 * c_out:4 * c_out])   # (C, 1)
        ch_ssq = (row_ssq[0 * c_out:1 * c_out] + row_ssq[1 * c_out:2 * c_out]
                  + row_ssq[2 * c_out:3 * c_out] + row_ssq[3 * c_out:4 * c_out])   # (C, 1)
        mean = ch_sum / count                                     # (C, 1)
        var = ch_ssq / count - mean * mean
        inv = jax.lax.rsqrt(var + EPS)

        # replicate per-channel stats to the 4 tap rows, fold in gamma/beta
        scale = jnp.tile(inv, (4, 1)) * gamma_r                   # (4C, 1)
        shift = beta_r - jnp.tile(mean, (4, 1)) * scale           # (4C, 1)

        yn = y * scale + shift                                    # (4C, HW) f32
        o_ref[n] = jnp.where(yn >= 0.0, yn, alpha * yn).astype(o_ref.dtype)   # PReLU, bf16 out


def conv_transpose_block(x_nchw, weight, bias, gamma, beta, alpha, *, samples_per_step=None):
    """x_nchw: (N, Cin, H, W); weight: (Cin, Cout, 2, 2) (PyTorch ConvTranspose2d layout)."""
    N, Cin, H, W = x_nchw.shape
    Cout = weight.shape[1]
    HW = H * W
    C4 = 4 * Cout

    if samples_per_step is None:
        samples_per_step = N            # single grid step: best on single-TC v5e/v6e
    assert N % samples_per_step == 0
    num_steps = N // samples_per_step

    # NCHW already has channels-on-sublanes / HW-on-lanes: FREE reshape, stays f32
    # (bf16 cast happens inside the kernel).
    x_flat = x_nchw.reshape(N, Cin, HW)

    # W4_T rows: tap-major (t = kh*2+kw), c_out minor;  row t*Cout+c = weight[:, c, kh, kw]
    w4t = jnp.transpose(weight, (2, 3, 1, 0)).reshape(C4, Cin).astype(jnp.bfloat16)

    # Conv bias is NOT used: GroupNorm(groups==channels) subtracts the per-channel mean,
    # which cancels any per-channel additive bias exactly.
    del bias

    gamma_r = jnp.tile(gamma, 4).reshape(C4, 1)
    beta_r = jnp.tile(beta, 4).reshape(C4, 1)
    params = jnp.stack([gamma_r, beta_r], axis=0).astype(jnp.float32)   # (2, 4C, 1)

    alpha_s = jnp.asarray(alpha, jnp.float32).reshape(1)                # SMEM scalar

    kernel = functools.partial(conv_tr_kernel, c_out=Cout, hw=HW, n_per_step=samples_per_step)
    out_flat = pl.pallas_call(
        kernel,
        out_shape=jax.ShapeDtypeStruct((N, C4, HW), jnp.bfloat16),
        grid_spec=pltpu.PrefetchScalarGridSpec(
            num_scalar_prefetch=0,
            grid=(num_steps,),
            in_specs=[
                pl.BlockSpec((samples_per_step, Cin, HW), lambda g: (g, 0, 0)),
                pl.BlockSpec((C4, Cin), lambda g: (0, 0)),
                pl.BlockSpec((2, C4, 1), lambda g: (0, 0, 0)),
                pl.BlockSpec(memory_space=pltpu.MemorySpace.SMEM),
            ],
            out_specs=pl.BlockSpec((samples_per_step, C4, HW), lambda g: (g, 0, 0)),
        ),
        compiler_params=pltpu.CompilerParams(
            dimension_semantics=("parallel",) if num_steps > 1 else ("arbitrary",),
        ),
    )(x_flat, w4t, params, alpha_s)

    # Tap interleave back to NCHW (now in bf16 -> half the HBM traffic of the f32 version):
    # (N, 4*Cout, HW) -> (n, kh, kw, c, h, w) -> (n, c, h, kh, w, kw) -> (N, Cout, 2H, 2W).
    # TODO(synk): fold this into the kernel (bitcast-packed kw interleave + kh via out layout)
    #             for the production/large-image path.
    out = out_flat.reshape(N, 2, 2, Cout, H, W)
    out = out.transpose(0, 3, 4, 1, 5, 2)
    return out.reshape(N, Cout, 2 * H, 2 * W)


def reference(x, weight, bias, gamma, beta, alpha):
    """Pure-JAX reference of the PyTorch module (bias kept here, as in PyTorch;
    it is mathematically cancelled by GroupNorm's mean subtraction).
    Conv inputs are rounded through bf16 to match the kernel's bf16 MXU matmul."""
    N, Cin, H, W = x.shape
    Cout = weight.shape[1]
    xq = x.astype(jnp.bfloat16).astype(jnp.float32)
    wq = weight.astype(jnp.bfloat16).astype(jnp.float32)
    # ConvTranspose2d k=2 s=2: out[n,o,2h+d,2w+k] = sum_c x[n,c,h,w] * W[c,o,d,k] + b[o]
    y = jnp.einsum("nchw,codk->nohdwk", xq, wq) + bias[None, :, None, None, None, None]
    y = y.reshape(N, Cout, 2 * H, 2 * W)
    # GroupNorm with groups == channels: per-(n, c) stats over spatial dims
    mean = y.mean(axis=(2, 3), keepdims=True)
    var = ((y - mean) ** 2).mean(axis=(2, 3), keepdims=True)
    yn = (y - mean) * jax.lax.rsqrt(var + EPS)
    yn = yn * gamma[None, :, None, None] + beta[None, :, None, None]
    return jnp.where(yn >= 0, yn, alpha * yn)


if __name__ == "__main__":
    key = jax.random.PRNGKey(0)
    k1, k2, k3, k4, k5 = jax.random.split(key, 5)

    N, Cin, H, W = 2, 4, 16, 16
    Cout = Cin // 2

    x = jax.random.normal(k1, (N, Cin, H, W), jnp.float32)
    weight = 0.1 * jax.random.normal(k2, (Cin, Cout, 2, 2), jnp.float32)   # ConvTranspose2d weight
    bias = 0.1 * jax.random.normal(k3, (Cout,), jnp.float32)               # ConvTranspose2d bias
    gamma = 1.0 + 0.1 * jax.random.normal(k4, (Cout,), jnp.float32)        # GroupNorm weight
    beta = 0.1 * jax.random.normal(k5, (Cout,), jnp.float32)               # GroupNorm bias
    alpha = 0.25                                                           # PReLU default init

    out = conv_transpose_block(x, weight, bias, gamma, beta, alpha)
    out = jax.block_until_ready(out)

    ref = reference(x, weight, bias, gamma, beta, alpha)
    assert out.shape == (N, Cout, 2 * H, 2 * W), out.shape
    # tolerance covers bf16 output rounding + reduction-order / single-pass-variance
    # differences; conv precision matches (bf16-rounded inputs, f32 accumulation) and the
    # dropped conv bias is exactly cancelled by GroupNorm's mean subtraction.
    err = float(jnp.max(jnp.abs(out.astype(jnp.float32) - ref)))
    assert jnp.allclose(out.astype(jnp.float32), ref, atol=2e-2, rtol=2e-2), err
    print("KERNEL_OK")
</pallas_src>

<mosaic_0001>
module attributes {stable_mosaic.version = 11 : i64} {
  func.func @conv_tr_kernel(%arg0: i32, %arg1: memref<2x4x256xf32, #tpu.memory_space<vmem>>, %arg2: memref<8x4xbf16, #tpu.memory_space<vmem>>, %arg3: memref<2x8x1xf32, #tpu.memory_space<vmem>>, %arg4: memref<1xf32, #tpu.memory_space<smem>>, %arg5: memref<2x8x256xbf16, #tpu.memory_space<vmem>>) attributes {dimension_semantics = [#tpu.dimension_semantics<arbitrary>], iteration_bounds = array<i64: 1>, scalar_prefetch = 0 : i64, scratch_operands = 0 : i64, tpu.core_type = #tpu.core_type<tc>, window_params = [{transform_indices = @transform_0, window_bounds = array<i64: 2, 4, 256>}, {pipeline_mode = #tpu.pipeline_mode<synchronous>, transform_indices = @transform_1, window_bounds = array<i64: 8, 4>}, {pipeline_mode = #tpu.pipeline_mode<synchronous>, transform_indices = @transform_2, window_bounds = array<i64: 2, 8, 1>}, {transform_indices = @transform_3, window_bounds = array<i64: 1>}, {transform_indices = @transform_4, window_bounds = array<i64: 2, 8, 256>}]} {
    %c0 = arith.constant 0 : index
    %c0_0 = arith.constant 0 : index
    %0 = vector.load %arg2[%c0, %c0_0] : memref<8x4xbf16, #tpu.memory_space<vmem>>, vector<8x4xbf16>
    %c0_1 = arith.constant 0 : index
    %c0_2 = arith.constant 0 : index
    %c0_3 = arith.constant 0 : index
    %1 = vector.load %arg3[%c0_1, %c0_2, %c0_3] : memref<2x8x1xf32, #tpu.memory_space<vmem>>, vector<1x8x1xf32>
    %2 = vector.shape_cast %1 : vector<1x8x1xf32> to vector<8x1xf32>
    %c1 = arith.constant 1 : index
    %c0_4 = arith.constant 0 : index
    %c0_5 = arith.constant 0 : index
    %3 = vector.load %arg3[%c1, %c0_4, %c0_5] : memref<2x8x1xf32, #tpu.memory_space<vmem>>, vector<1x8x1xf32>
    %4 = vector.shape_cast %3 : vector<1x8x1xf32> to vector<8x1xf32>
    %c0_6 = arith.constant 0 : index
    %5 = memref.load %arg4[%c0_6] : memref<1xf32, #tpu.memory_space<smem>>
    %c0_7 = arith.constant 0 : index
    %c0_8 = arith.constant 0 : index
    %c0_9 = arith.constant 0 : index
    %6 = vector.load %arg1[%c0_7, %c0_8, %c0_9] : memref<2x4x256xf32, #tpu.memory_space<vmem>>, vector<1x4x256xf32>
    %7 = vector.shape_cast %6 : vector<1x4x256xf32> to vector<4x256xf32>
    %8 = arith.truncf %7 : vector<4x256xf32> to vector<4x256xbf16>
    %cst = arith.constant dense<0.000000e+00> : vector<8x256xf32>
    %9 = tpu.matmul %0, %8, %cst {dimension_numbers = #tpu.dot_dimension_numbers<[1], [0], [0], [1], [0, 0, 1, 1], [], []>} : vector<8x4xbf16>, vector<4x256xbf16>, vector<8x256xf32> -> vector<8x256xf32>
    %cst_10 = arith.constant dense<0.000000e+00> : vector<8xf32>
    %10 = vector.multi_reduction <add>, %9, %cst_10 [1] : vector<8x256xf32> to vector<8xf32>
    %11 = vector.shape_cast %10 : vector<8xf32> to vector<8x1xf32>
    %12 = arith.mulf %9, %9 : vector<8x256xf32>
    %cst_11 = arith.constant dense<0.000000e+00> : vector<8xf32>
    %13 = vector.multi_reduction <add>, %12, %cst_11 [1] : vector<8x256xf32> to vector<8xf32>
    %14 = vector.shape_cast %13 : vector<8xf32> to vector<8x1xf32>
    %15 = vector.extract_strided_slice %11 {offsets = [0, 0], sizes = [2, 1], strides = [1, 1]} : vector<8x1xf32> to vector<2x1xf32>
    %16 = vector.extract_strided_slice %11 {offsets = [2, 0], sizes = [2, 1], strides = [1, 1]} : vector<8x1xf32> to vector<2x1xf32>
    %17 = arith.addf %15, %16 : vector<2x1xf32>
    %18 = vector.extract_strided_slice %11 {offsets = [4, 0], sizes = [2, 1], strides = [1, 1]} : vector<8x1xf32> to vector<2x1xf32>
    %19 = arith.addf %17, %18 : vector<2x1xf32>
    %20 = vector.extract_strided_slice %11 {offsets = [6, 0], sizes = [2, 1], strides = [1, 1]} : vector<8x1xf32> to vector<2x1xf32>
    %21 = arith.addf %19, %20 : vector<2x1xf32>
    %22 = vector.extract_strided_slice %14 {offsets = [0, 0], sizes = [2, 1], strides = [1, 1]} : vector<8x1xf32> to vector<2x1xf32>
    %23 = vector.extract_strided_slice %14 {offsets = [2, 0], sizes = [2, 1], strides = [1, 1]} : vector<8x1xf32> to vector<2x1xf32>
    %24 = arith.addf %22, %23 : vector<2x1xf32>
    %25 = vector.extract_strided_slice %14 {offsets = [4, 0], sizes = [2, 1], strides = [1, 1]} : vector<8x1xf32> to vector<2x1xf32>
    %26 = arith.addf %24, %25 : vector<2x1xf32>
    %27 = vector.extract_strided_slice %14 {offsets = [6, 0], sizes = [2, 1], strides = [1, 1]} : vector<8x1xf32> to vector<2x1xf32>
    %28 = arith.addf %26, %27 : vector<2x1xf32>
    %cst_12 = arith.constant 1.024000e+03 : f32
    %29 = vector.broadcast %cst_12 : f32 to vector<2x1xf32>
    %30 = arith.divf %21, %29 : vector<2x1xf32>
    %cst_13 = arith.constant 1.024000e+03 : f32
    %31 = vector.broadcast %cst_13 : f32 to vector<2x1xf32>
    %32 = arith.divf %28, %31 : vector<2x1xf32>
    %33 = arith.mulf %30, %30 : vector<2x1xf32>
    %34 = arith.subf %32, %33 : vector<2x1xf32>
    %cst_14 = arith.constant 9.99999974E-6 : f32
    %35 = vector.broadcast %cst_14 : f32 to vector<2x1xf32>
    %36 = arith.addf %34, %35 : vector<2x1xf32>
    %37 = math.rsqrt %36 : vector<2x1xf32>
    %38 = tpu.concatenate %37, %37, %37, %37 in 0 : vector<2x1xf32>, vector<2x1xf32>, vector<2x1xf32>, vector<2x1xf32> -> vector<8x1xf32>
    %39 = arith.mulf %38, %2 : vector<8x1xf32>
    %40 = tpu.concatenate %30, %30, %30, %30 in 0 : vector<2x1xf32>, vector<2x1xf32>, vector<2x1xf32>, vector<2x1xf32> -> vector<8x1xf32>
    %41 = arith.mulf %40, %39 : vector<8x1xf32>
    %42 = arith.subf %4, %41 : vector<8x1xf32>
    %43 = vector.broadcast %39 : vector<8x1xf32> to vector<8x256xf32>
    %44 = arith.mulf %9, %43 : vector<8x256xf32>
    %45 = vector.broadcast %42 : vector<8x1xf32> to vector<8x256xf32>
    %46 = arith.addf %44, %45 : vector<8x256xf32>
    %cst_15 = arith.constant 0.000000e+00 : f32
    %47 = vector.broadcast %cst_15 : f32 to vector<8x256xf32>
    %48 = arith.cmpf oge, %46, %47 : vector<8x256xf32>
    %49 = vector.broadcast %5 : f32 to vector<8x256xf32>
    %50 = arith.mulf %49, %46 : vector<8x256xf32>
    %51 = arith.select %48, %46, %50 : vector<8x256xi1>, vector<8x256xf32>
    %52 = arith.truncf %51 : vector<8x256xf32> to vector<8x256xbf16>
    %c0_16 = arith.constant 0 : index
    %c0_17 = arith.constant 0 : index
    %c0_18 = arith.constant 0 : index
    %53 = vector.load %arg5[%c0_16, %c0_17, %c0_18] : memref<2x8x256xbf16, #tpu.memory_space<vmem>>, vector<1x8x256xbf16>
    %54 = vector.shape_cast %53 : vector<1x8x256xbf16> to vector<8x256xbf16>
    %55 = vector.shape_cast %52 : vector<8x256xbf16> to vector<1x8x256xbf16>
    tpu.vector_store %arg5[%c0_16, %c0_17, %c0_18], %55 {strides = array<i32>} : memref<2x8x256xbf16, #tpu.memory_space<vmem>>, vector<1x8x256xbf16>,
    %c1_19 = arith.constant 1 : index
    %c0_20 = arith.constant 0 : index
    %c0_21 = arith.constant 0 : index
    %56 = vector.load %arg1[%c1_19, %c0_20, %c0_21] : memref<2x4x256xf32, #tpu.memory_space<vmem>>, vector<1x4x256xf32>
    %57 = vector.shape_cast %56 : vector<1x4x256xf32> to vector<4x256xf32>
    %58 = arith.truncf %57 : vector<4x256xf32> to vector<4x256xbf16>
    %cst_22 = arith.constant dense<0.000000e+00> : vector<8x256xf32>
    %59 = tpu.matmul %0, %58, %cst_22 {dimension_numbers = #tpu.dot_dimension_numbers<[1], [0], [0], [1], [0, 0, 1, 1], [], []>} : vector<8x4xbf16>, vector<4x256xbf16>, vector<8x256xf32> -> vector<8x256xf32>
    %cst_23 = arith.constant dense<0.000000e+00> : vector<8xf32>
    %60 = vector.multi_reduction <add>, %59, %cst_23 [1] : vector<8x256xf32> to vector<8xf32>
    %61 = vector.shape_cast %60 : vector<8xf32> to vector<8x1xf32>
    %62 = arith.mulf %59, %59 : vector<8x256xf32>
    %cst_24 = arith.constant dense<0.000000e+00> : vector<8xf32>
    %63 = vector.multi_reduction <add>, %62, %cst_24 [1] : vector<8x256xf32> to vector<8xf32>
    %64 = vector.shape_cast %63 : vector<8xf32> to vector<8x1xf32>
    %65 = vector.extract_strided_slice %61 {offsets = [0, 0], sizes = [2, 1], strides = [1, 1]} : vector<8x1xf32> to vector<2x1xf32>
    %66 = vector.extract_strided_slice %61 {offsets = [2, 0], sizes = [2, 1], strides = [1, 1]} : vector<8x1xf32> to vector<2x1xf32>
    %67 = arith.addf %65, %66 : vector<2x1xf32>
    %68 = vector.extract_strided_slice %61 {offsets = [4, 0], sizes = [2, 1], strides = [1, 1]} : vector<8x1xf32> to vector<2x1xf32>
    %69 = arith.addf %67, %68 : vector<2x1xf32>
    %70 = vector.extract_strided_slice %61 {offsets = [6, 0], sizes = [2, 1], strides = [1, 1]} : vector<8x1xf32> to vector<2x1xf32>
    %71 = arith.addf %69, %70 : vector<2x1xf32>
    %72 = vector.extract_strided_slice %64 {offsets = [0, 0], sizes = [2, 1], strides = [1, 1]} : vector<8x1xf32> to vector<2x1xf32>
    %73 = vector.extract_strided_slice %64 {offsets = [2, 0], sizes = [2, 1], strides = [1, 1]} : vector<8x1xf32> to vector<2x1xf32>
    %74 = arith.addf %72, %73 : vector<2x1xf32>
    %75 = vector.extract_strided_slice %64 {offsets = [4, 0], sizes = [2, 1], strides = [1, 1]} : vector<8x1xf32> to vector<2x1xf32>
    %76 = arith.addf %74, %75 : vector<2x1xf32>
    %77 = vector.extract_strided_slice %64 {offsets = [6, 0], sizes = [2, 1], strides = [1, 1]} : vector<8x1xf32> to vector<2x1xf32>
    %78 = arith.addf %76, %77 : vector<2x1xf32>
    %cst_25 = arith.constant 1.024000e+03 : f32
    %79 = vector.broadcast %cst_25 : f32 to vector<2x1xf32>
    %80 = arith.divf %71, %79 : vector<2x1xf32>
    %cst_26 = arith.constant 1.024000e+03 : f32
    %81 = vector.broadcast %cst_26 : f32 to vector<2x1xf32>
    %82 = arith.divf %78, %81 : vector<2x1xf32>
    %83 = arith.mulf %80, %80 : vector<2x1xf32>
    %84 = arith.subf %82, %83 : vector<2x1xf32>
    %cst_27 = arith.constant 9.99999974E-6 : f32
    %85 = vector.broadcast %cst_27 : f32 to vector<2x1xf32>
    %86 = arith.addf %84, %85 : vector<2x1xf32>
    %87 = math.rsqrt %86 : vector<2x1xf32>
    %88 = tpu.concatenate %87, %87, %87, %87 in 0 : vector<2x1xf32>, vector<2x1xf32>, vector<2x1xf32>, vector<2x1xf32> -> vector<8x1xf32>
    %89 = arith.mulf %88, %2 : vector<8x1xf32>
    %90 = tpu.concatenate %80, %80, %80, %80 in 0 : vector<2x1xf32>, vector<2x1xf32>, vector<2x1xf32>, vector<2x1xf32> -> vector<8x1xf32>
    %91 = arith.mulf %90, %89 : vector<8x1xf32>
    %92 = arith.subf %4, %91 : vector<8x1xf32>
    %93 = vector.broadcast %89 : vector<8x1xf32> to vector<8x256xf32>
    %94 = arith.mulf %59, %93 : vector<8x256xf32>
    %95 = vector.broadcast %92 : vector<8x1xf32> to vector<8x256xf32>
    %96 = arith.addf %94, %95 : vector<8x256xf32>
    %cst_28 = arith.constant 0.000000e+00 : f32
    %97 = vector.broadcast %cst_28 : f32 to vector<8x256xf32>
    %98 = arith.cmpf oge, %96, %97 : vector<8x256xf32>
    %99 = vector.broadcast %5 : f32 to vector<8x256xf32>
    %100 = arith.mulf %99, %96 : vector<8x256xf32>
    %101 = arith.select %98, %96, %100 : vector<8x256xi1>, vector<8x256xf32>
    %102 = arith.truncf %101 : vector<8x256xf32> to vector<8x256xbf16>
    %c1_29 = arith.constant 1 : index
    %c0_30 = arith.constant 0 : index
    %c0_31 = arith.constant 0 : index
    %103 = vector.load %arg5[%c1_29, %c0_30, %c0_31] : memref<2x8x256xbf16, #tpu.memory_space<vmem>>, vector<1x8x256xbf16>
    %104 = vector.shape_cast %103 : vector<1x8x256xbf16> to vector<8x256xbf16>
    %105 = vector.shape_cast %102 : vector<8x256xbf16> to vector<1x8x256xbf16>
    tpu.vector_store %arg5[%c1_29, %c0_30, %c0_31], %105 {strides = array<i32>} : memref<2x8x256xbf16, #tpu.memory_space<vmem>>, vector<1x8x256xbf16>,
    return
  }
  func.func @transform_0(%arg0: i32) -> (i32, i32, i32) {
    %c0_i32 = arith.constant 0 : i32
    %c0_i32_0 = arith.constant 0 : i32
    %c0_i32_1 = arith.constant 0 : i32
    return %arg0, %c0_i32, %c0_i32_0 : i32, i32, i32
  }
  func.func @transform_1(%arg0: i32) -> (i32, i32) {
    %c0_i32 = arith.constant 0 : i32
    %c0_i32_0 = arith.constant 0 : i32
    %c0_i32_1 = arith.constant 0 : i32
    return %c0_i32, %c0_i32_0 : i32, i32
  }
  func.func @transform_2(%arg0: i32) -> (i32, i32, i32) {
    %c0_i32 = arith.constant 0 : i32
    %c0_i32_0 = arith.constant 0 : i32
    %c0_i32_1 = arith.constant 0 : i32
    %c0_i32_2 = arith.constant 0 : i32
    return %c0_i32, %c0_i32_0, %c0_i32_1 : i32, i32, i32
  }
  func.func @transform_3(%arg0: i32) -> i32 {
    %c0_i32 = arith.constant 0 : i32
    %c0_i32_0 = arith.constant 0 : i32
    return %c0_i32 : i32
  }
  func.func @transform_4(%arg0: i32) -> (i32, i32, i32) {
    %c0_i32 = arith.constant 0 : i32
    %c0_i32_0 = arith.constant 0 : i32
    %c0_i32_1 = arith.constant 0 : i32
    return %arg0, %c0_i32, %c0_i32_0 : i32, i32, i32
  }
}

</mosaic_0001>

<bundles_post_ra>
// kernel: tpu_custom_call.1
= control target key start
LH: loop header
LB: loop body
LE: loop exit
PB: predicated region body
PF: predicated region fallthrough
CT: control target
= control target key end

     0   :  { %vm35_vm0 = vcmask 1041408   ;;  %v374_v6 = vmov 0   ;;  %s464_s0 = inlined_call_operand.vmem [shape: f32[2,4,256], index: 0, kind: input, shape index: {}]   ;;  %s465_s1 = inlined_call_operand.vmem [shape: bf16[8,4], index: 1, kind: input, shape index: {}]   ;;  %s466_s2 = inlined_call_operand.vmem [shape: f32[2,8,1], index: 2, kind: input, shape index: {}]   ;;  %s467_s3 = inlined_call_operand.<no memory space> [shape: f32[1], index: 3, kind: input, shape index: {}]   ;;  %s468_s4 = inlined_call_operand.hbm [shape: bf16[2,8,256], index: 4, kind: output, shape index: {}]  }
   0x1   :  { %v25_v0 = vld [vmem:[%s464_s0] sm:$0xff]  ;;  %v334_v1 = vld [vmem:[%s464_s0 + $0x8] sm:$0xff]  ;;  %74 = vmatprep.mubr.bf16.mxu0 %v374_v6 }
   0x2   :  { %v27_v2 = vcombine.high %v25_v0, %v25_v0  ;;  %v176_v3 = vcombine.high %v334_v1, %v334_v1  ;;  %v29_v4 = vpack.c.bf16 %v25_v0, %v25_v0  ;;  %v178_v5 = vpack.c.bf16 %v334_v1, %v334_v1 }
   0x3   :  { %10 = vsyncpa [#allocation4], 0  ;;  %218 = vmatprep.mubr.bf16.mxu1 %v374_v6  ;;  %344 = vset.pattern.permute.xlu0 %v374_v6  ;;  %v20_v11 = vld [vmem:[%s465_s1] sm:$0xf]  ;;  %vm31_vm1 = vcmask 31744   ;;  %vm126_vm2 = vcmask 1043456  }
   0x4   :  { %v30_v7 = vpack.c.bf16 %v27_v2, %v27_v2  ;;  %v179_v8 = vpack.c.bf16 %v176_v3, %v176_v3  ;;  %v37_v9 = vsel %vm35_vm0, %v29_v4, 0  ;;  %v181_v10 = vsel %vm35_vm0, %v178_v5, 0  ;;  %345 = vset.pattern.permute.xlu1 %v374_v6 }
   0x5   :  { %vm128_vm3 = vcmask 1045504  }
   0x6   :  { %331 = vmatprep.subr.msk.bf16.mxu0 %vm35_vm0, %v30_v7  ;;  %335 = vmatprep.subr.msk.bf16.mxu1 %vm35_vm0, %v179_v8  ;;  %v21_v7 = vld [vmem:[%s466_s2] sm:$0xff] }
   0x7   :  { %57 = vmatpush1.bf16.msra.mxu0 %v37_v9  ;;  %201 = vmatpush1.bf16.msra.mxu1 %v181_v10 }
   0xa   :  { %332 = vmatmul.mubr.msk.bf16.vlgmr.msra.gmra.mxu0 %vm31_vm1, %v20_v11  ;;  %336 = vmatmul.mubr.msk.bf16.vlgmr.msra.gmra.mxu1 %vm31_vm1, %v20_v11 }
  0xca   :  { %v416_v12 = vpop.f32.mrf.mxu0  ;;  %v418_v13 = vpop.f32.mrf.mxu1 }
  0xcb   :  { %v86_v17 = vmul.f32 %v416_v12, %v416_v12  ;;  %v230_v22 = vmul.f32 %v418_v13, %v418_v13 }
  0xcc   :  { %v420_v14 = vpop.f32.mrf.mxu0  ;;  %v422_v15 = vpop.f32.mrf.mxu1 }
  0xcd   :  { %v83_v16 = vadd.f32 %v420_v14, %v416_v12  ;;  %v87_v18 = vmul.f32 %v420_v14, %v420_v14  ;;  %v231_v23 = vmul.f32 %v422_v15, %v422_v15  ;;  %v227_v26 = vadd.f32 %v422_v15, %v418_v13 }
  0xce   :  { %v80_v19 = vpop.f32.mrf.mxu0  ;;  %v224_v20 = vpop.f32.mrf.mxu1 }
  0xcf   :  { %84 = vadd.xlane.f32.xlu0 %v83_v16  ;;  %v88_v21 = vadd.f32 %v87_v18, %v86_v17  ;;  %v232_v27 = vadd.f32 %v231_v23, %v230_v22 }
  0xd0   :  { %v81_v24 = vpop.f32.mrf.mxu0  ;;  %v225_v25 = vpop.f32.mrf.mxu1 }
  0xd1   :  { %89 = vadd.xlane.f32.xlu1 %v88_v21 }
  0xd3   :  { %228 = vadd.xlane.f32.xlu0 %v227_v26 }
  0xd5   :  { %233 = vadd.xlane.f32.xlu1 %v232_v27 }
 0x158   :  { %v85_v28 = vpop.xlane.xlu0 %84 }
 0x159   :  { %v92_v29 = vrot.slane %v85_v28, 2  ;;  %v95_v32 = vrot.slane %v85_v28, 4  ;;  %v98_v34 = vrot.slane %v85_v28, 6 }
 0x15a   :  { %v90_v30 = vpop.xlane.xlu1 %89 }
 0x15b   :  { %v94_v31 = vadd.f32 %v92_v29, %v85_v28  ;;  %v102_v33 = vrot.slane %v90_v30, 2  ;;  %v105_v38 = vrot.slane %v90_v30, 4  ;;  %v108_v40 = vrot.slane %v90_v30, 6 }
 0x15c   :  { %v229_v35 = vpop.xlane.xlu0 %228 }
 0x15d   :  { %v97_v36 = vadd.f32 %v95_v32, %v94_v31  ;;  %v104_v37 = vadd.f32 %v102_v33, %v90_v30  ;;  %v236_v39 = vrot.slane %v229_v35, 2  ;;  %v239_v41 = vrot.slane %v229_v35, 4 }
 0x15e   :  { %v234_v42 = vpop.xlane.xlu1 %233  ;;  %v242_v47 = vrot.slane %v229_v35, 6 }
 0x15f   :  { %v100_v43 = vadd.f32 %v98_v34, %v97_v36  ;;  %v107_v44 = vadd.f32 %v105_v38, %v104_v37  ;;  %v238_v45 = vadd.f32 %v236_v39, %v229_v35  ;;  %v246_v46 = vrot.slane %v234_v42, 2  ;;  %v330_v34 = vld [vmem:[%s466_s2 + $0x8] sm:$0xff]  ;;  %s375_s2 = smov [#allocation3]  }
 0x160   :  { %v249_v48 = vrot.slane %v234_v42, 4  ;;  %v252_v53 = vrot.slane %v234_v42, 6 }
 0x161   :  { %v112_v49 = vmul.f32 0.0009765625, %v100_v43  ;;  %v110_v50 = vadd.f32 %v108_v40, %v107_v44  ;;  %v241_v51 = vadd.f32 %v239_v41, %v238_v45  ;;  %v248_v52 = vadd.f32 %v246_v46, %v234_v42 }
 0x162   :  { %v159_v44 = vstv %s467_s3  ;;  %s319_s3 = sshll.u32 %s375_s2, 4  ;;  %s320_s3 = int_to_ptr.vmem [resolvable:$true] %s319_s3 }
 0x163   :  { %v113_v54 = vmul.f32 0.0009765625, %v110_v50  ;;  %v114_v55 = vmul.f32 %v112_v49, %v112_v49  ;;  %v244_v56 = vadd.f32 %v242_v47, %v241_v51  ;;  %v251_v57 = vadd.f32 %v249_v48, %v248_v52  ;;  %s352_s25 = scalar_lea.vmem %s320_s3, 256  ;;  %p357_p1 = scmp.lt.s32.totalorder %s320_s3, %s320_s3 }
 0x164   :  { %v132_v2 = vrot.slane %v112_v49, 6  ;;  %v134_v6 = vrot.slane %v112_v49, 4  ;;  %v136_v26 = vrot.slane %v112_v49, 2  ;;  %p353_p0 = scmp.ne.s32.totalorder %s320_s3, %s352_s25  ;;  %p358_p2 = scmp.lt.s32.totalorder %s352_s25, %s352_s25 }
 0x165   :  { %v115_v58 = vsub.f32 %v113_v54, %v114_v55  ;;  %v255_v59 = vmul.f32 0.0009765625, %v244_v56  ;;  %v254_v60 = vadd.f32 %v252_v53, %v251_v57 }
 0x166   :  { %v138_v10 = vsel %vm35_vm0, %v112_v49, %v132_v2  ;;  %p359_p3 = por %p358_p2, %p357_p1 }
 0x167   :  { %v116_v61 = vadd.f32 1e-05, %v115_v58  ;;  %v256_v62 = vmul.f32 0.0009765625, %v254_v60  ;;  %v257_v63 = vmul.f32 %v255_v59, %v255_v59  ;;  %v273_v11 = vrot.slane %v255_v59, 6 }
 0x168   :  { %v139_v22 = vsel %vm126_vm2, %v138_v10, %v134_v6  ;;  %v275_v23 = vrot.slane %v255_v59, 4  ;;  %v277_v35 = vrot.slane %v255_v59, 2  ;;  %p360_p4 = pnand %p359_p3, %p353_p0 }
 0x169   :  { %348 = vrsqrt.f32 %v116_v61  ;;  %v258_v0 = vsub.f32 %v256_v62, %v257_v63  ;;  %v279_v27 = vsel %vm35_vm0, %v255_v59, %v273_v11  ;;  %v140_v30 = vsel %vm128_vm3, %v139_v22, %v136_v26 }
 0x16a   :  { %v280_v33 = vsel %vm126_vm2, %v279_v27, %v275_v23 }
 0x16b   :  { %v259_v1 = vadd.f32 1e-05, %v258_v0  ;;  %v281_v36 = vsel %vm128_vm3, %v280_v33, %v277_v35 }
 0x16d   :  { %350 = vrsqrt.f32 %v259_v1 }
 0x176   :  { %v349_v3 = vpop.eup %348 }
 0x177   :  { %v119_v4 = vrot.slane %v349_v3, 6  ;;  %v121_v5 = vrot.slane %v349_v3, 4  ;;  %v123_v8 = vrot.slane %v349_v3, 2 }
 0x179   :  { %v125_v9 = vsel %vm35_vm0, %v349_v3, %v119_v4 }
 0x17a   :  { %v351_v16 = vpop.eup %350  ;;  %v127_v17 = vsel %vm126_vm2, %v125_v9, %v121_v5 }
 0x17b   :  { %v129_v18 = vsel %vm128_vm3, %v127_v17, %v123_v8  ;;  %v262_v19 = vrot.slane %v351_v16, 6  ;;  %v264_v20 = vrot.slane %v351_v16, 4  ;;  %v266_v24 = vrot.slane %v351_v16, 2 }
 0x17c   :  { %v130_v21 = vmul.f32 %v129_v18, %v21_v7 }
 0x17d   :  { %v268_v25 = vsel %vm35_vm0, %v351_v16, %v262_v19 }
 0x17e   :  { %145 = vperm.xlu0 %344, %v130_v21   ;;  %v269_v28 = vsel %vm126_vm2, %v268_v25, %v264_v20  ;;  %v141_v32 = vmul.f32 %v140_v30, %v130_v21 }
 0x17f   :  { %v270_v29 = vsel %vm128_vm3, %v269_v28, %v266_v24 }
 0x180   :  { %v271_v31 = vmul.f32 %v270_v29, %v21_v7  ;;  %v142_v37 = vsub.f32 %v330_v34, %v141_v32 }
 0x182   :  { %286 = vperm.xlu1 %345, %v271_v31   ;;  %v282_v38 = vmul.f32 %v281_v36, %v271_v31 }
 0x184   :  { %v283_v39 = vsub.f32 %v330_v34, %v282_v38 }
 0x186   :  { %152 = vperm.xlu1 %345, %v142_v37  }
 0x18a   :  { %293 = vperm.xlu1 %345, %v283_v39  }
 0x1f9   :  { %v146_v40 = vpop.permute.xlu0 %145 }
 0x1fa   :  { %v148_v42 = vmul.f32 %v146_v40, %v416_v12  ;;  %v149_v43 = vmul.f32 %v146_v40, %v420_v14 }
 0x1fd   :  { %v287_v41 = vpop.permute.xlu1 %286 }
 0x1fe   :  { %v289_v48 = vmul.f32 %v287_v41, %v418_v13  ;;  %v290_v49 = vmul.f32 %v287_v41, %v422_v15 }
 0x201   :  { %v153_v45 = vpop.permute.xlu1 %152 }
 0x202   :  { %v155_v46 = vadd.f32 %v153_v45, %v148_v42  ;;  %v156_v47 = vadd.f32 %v153_v45, %v149_v43 }
 0x204   :  { %vm157_vm4 = vcmp.ge.f32.partialorder %v155_v46, 0.0  ;;  %vm158_vm5 = vcmp.ge.f32.partialorder %v156_v47, 0.0  ;;  %v160_v50 = vmul.f32 %v159_v44, %v155_v46  ;;  %v161_v51 = vmul.f32 %v159_v44, %v156_v47 }
 0x205   :  { %v294_v52 = vpop.permute.xlu1 %293 }
 0x206   :  { %v162_v53 = vsel %vm157_vm4, %v155_v46, %v160_v50  ;;  %v163_v12 = vsel %vm158_vm5, %v156_v47, %v161_v51  ;;  %v296_v54 = vadd.f32 %v294_v52, %v289_v48  ;;  %v297_v14 = vadd.f32 %v294_v52, %v290_v49 }
 0x207   :  { %v338_v55 = vpack.c.bf16 %v163_v12, %v162_v53 }
 0x208   :  { %vm298_vm6 = vcmp.ge.f32.partialorder %v296_v54, 0.0  ;;  %vm299_vm7 = vcmp.ge.f32.partialorder %v297_v14, 0.0  ;;  %v300_v56 = vmul.f32 %v296_v54, %v159_v44  ;;  %v301_v57 = vmul.f32 %v297_v14, %v159_v44 }
 0x209   :  { %172 = vst [vmem:[#allocation3] sm:$0xff] %v338_v55 }
 0x20a   :  { %v302_v13 = vsel %vm298_vm6, %v296_v54, %v300_v56  ;;  %v303_v58 = vsel %vm299_vm7, %v297_v14, %v301_v57 }
 0x20b   :  { %v339_v15 = vpack.c.bf16 %v303_v58, %v302_v13 }
 0x20d   :  { %313 = vst [vmem:[#allocation3 + $0x8] sm:$0xff] %v339_v15 }
 0x20e   :  { %363 = shalt.err (!%p360_p4)
}
 0x20f   :  { %s376_s26 = smov 128   ;;  %s377_s27 = smov 8  }
 0x210   :  { %325 = dma.vmem_to_hbm [thread:$0]  %s320_s3, 256, %s468_s4, [#allocation4], %s376_s26, %s376_s26, %s377_s27  }
 0x211   :  { %372 = dma.done.wait [#allocation4], 256  }
 0x212   :  { %373 = vsyncadd [#allocation4], 4294967040 }
 0x213   :  { %329 = vsyncpa [#allocation4], 1 }

</bundles_post_ra>
